<compile_context>
chip_gen: v7x
topology: tpu7x:2x2x1
jax: 0.10.0
libtpu: 0.0.40
codegen_flags: <defaults>
</compile_context>

<pallas_src>
import math

import jax
import jax.numpy as jnp
from jax.experimental import pallas as pl
from jax.experimental.pallas import tpu as pltpu

_LANES = 128
_SUBLANES = 8


def _fill_kernel(means_ref, *o_refs):
    # means_ref : SMEM (N,)        — means[ids[n]], already cast to out dtype
    # o_refs    : N VMEM (rb, 128) — one lane-dense output tile per target
    # N is small and static -> unrolled at trace time; each store is a full
    # unmasked (rb, 128) broadcast-store.
    # TODO(synk): for very large N, tile over targets instead of unrolling.
    for n, o_ref in enumerate(o_refs):
        o_ref[...] = jnp.full(o_ref.shape, means_ref[n], dtype=o_ref.dtype)


def model_a_forward(targets, means, ids):
    """Pallas implementation of ModelA.forward().

    targets : list of jnp arrays, all with the SAME shape and dtype
              (only shape/dtype are used, like torch.empty_like)
    means   : 1-D jnp array of per-image means
    ids     : list/array of int indices into `means`, len == len(targets)

    Returns a list of arrays, predictions[n] filled with means[ids[n]].
    """
    # TODO(synk): heterogeneous per-target shapes/dtypes (allowed by the torch
    # list-of-tensors API) are not supported; all targets share shape/dtype.
    n_targets = len(targets)
    shape = tuple(targets[0].shape)
    dtype = jnp.dtype(targets[0].dtype)
    itemsize = dtype.itemsize
    total = math.prod(shape)

    # Lane-dense layout: flatten to rows of 128 lanes; pad rows to the
    # dtype's packed sublane count (8 for 32-bit, 16 for bf16, 32 for int8).
    pack = max(_SUBLANES, 32 // itemsize)
    rows = pl.cdiv(total, _LANES)
    rows_padded = ((rows + pack - 1) // pack) * pack

    # Pick the row-tile as a divisor of rows_padded (no over-allocation),
    # capped at ~8 MiB total per grid step, and prefer >=2 grid blocks for
    # non-tiny fills so v7x's two TensorCores both get work.
    units = rows_padded // pack
    bytes_per_unit = n_targets * pack * _LANES * itemsize
    max_block_bytes = 8 * 1024 * 1024
    cap_units = max(1, max_block_bytes // bytes_per_unit)
    if units >= 2 and units * bytes_per_unit > (2 * 1024 * 1024):
        cap_units = min(cap_units, (units + 1) // 2)
    cap_units = min(cap_units, units)
    rb_units = max(d for d in range(1, cap_units + 1) if units % d == 0)
    rb = rb_units * pack
    num_row_blocks = units // rb_units

    # Select means per target (glue in plain JAX), flat 1-D for SMEM.
    means_selected = jnp.asarray(means)[jnp.asarray(ids, dtype=jnp.int32)]
    means_selected = means_selected.astype(dtype).reshape(n_targets)

    # Scoped-VMEM budget: double-buffered output blocks + slack; explicit so
    # v5e's 16 MiB default never OOMs and v7x (64 MiB physical) is respected.
    block_bytes = n_targets * rb * _LANES * itemsize
    vmem_limit = min(max(2 * block_bytes + (4 << 20), 16 << 20), 48 << 20)

    out_bytes = n_targets * rows_padded * _LANES * itemsize

    out_shapes = tuple(
        jax.ShapeDtypeStruct((rows_padded, _LANES), dtype)
        for _ in range(n_targets)
    )
    out_specs = tuple(
        pl.BlockSpec((rb, _LANES), lambda r: (r, 0))
        for _ in range(n_targets)
    )

    outs = pl.pallas_call(
        _fill_kernel,
        out_shape=out_shapes,
        grid=(num_row_blocks,),
        in_specs=[
            # Whole (N,) means array resident in SMEM for every grid step.
            pl.BlockSpec(memory_space=pltpu.MemorySpace.SMEM),
        ],
        out_specs=out_specs,
        compiler_params=pltpu.CompilerParams(
            dimension_semantics=("parallel",),
            vmem_limit_bytes=vmem_limit,
        ),
        cost_estimate=pl.CostEstimate(
            flops=0,
            transcendentals=0,
            bytes_accessed=out_bytes + n_targets * itemsize,
        ),
    )(means_selected)

    # Restore original per-target shapes.  When total is already tile-aligned
    # (the common image case) this is a free metadata reshape; otherwise the
    # unavoidable un-pad slice happens per target.
    predictions = []
    for out_n in outs:
        if rows_padded * _LANES == total:
            predictions.append(out_n.reshape(shape))
        else:
            predictions.append(out_n.reshape(-1)[:total].reshape(shape))
    return predictions


if __name__ == "__main__":
    key = jax.random.PRNGKey(0)
    k_t0, k_t1, k_m = jax.random.split(key, 3)

    # Two image-like targets (C, H, W) = (4, 16, 16); values are irrelevant
    # (torch.empty_like only uses shape/dtype), but we build them anyway.
    targets = [
        jax.random.normal(k_t0, (4, 16, 16), dtype=jnp.float32),
        jax.random.normal(k_t1, (4, 16, 16), dtype=jnp.float32),
    ]
    # A bank of 5 precomputed image means; ids select which mean per target.
    means = jax.random.normal(k_m, (5,), dtype=jnp.float32)
    ids = [3, 1]

    preds = model_a_forward(targets, means, ids)
    preds = [jax.block_until_ready(p) for p in preds]

    # Verify against the reference semantics: each prediction is a constant
    # tensor of the target's shape, filled with means[ids[n]].
    import numpy as np

    for n, p in enumerate(preds):
        expected = np.full(targets[n].shape, float(means[ids[n]]),
                           dtype=np.float32)
        np.testing.assert_allclose(np.asarray(p), expected, rtol=0, atol=0)
        assert p.shape == targets[n].shape and p.dtype == targets[n].dtype

    print("KERNEL_OK")
</pallas_src>

<mosaic_0001>
module attributes {stable_mosaic.version = 11 : i64} {
  func.func @_fill_kernel(%arg0: i32, %arg1: memref<2xf32, #tpu.memory_space<smem>>, %arg2: memref<8x128xf32, #tpu.memory_space<vmem>>, %arg3: memref<8x128xf32, #tpu.memory_space<vmem>>) attributes {dimension_semantics = [#tpu.dimension_semantics<parallel>], iteration_bounds = array<i64: 1>, scalar_prefetch = 0 : i64, scratch_operands = 0 : i64, tpu.core_type = #tpu.core_type<tc>, window_params = [{transform_indices = @transform_0, window_bounds = array<i64: 2>}, {transform_indices = @transform_1, window_bounds = array<i64: 8, 128>}, {transform_indices = @transform_2, window_bounds = array<i64: 8, 128>}]} {
    %c0 = arith.constant 0 : index
    %0 = memref.load %arg1[%c0] : memref<2xf32, #tpu.memory_space<smem>>
    %1 = vector.broadcast %0 : f32 to vector<8x128xf32>
    %c0_0 = arith.constant 0 : index
    %c0_1 = arith.constant 0 : index
    %2 = vector.load %arg2[%c0_0, %c0_1] : memref<8x128xf32, #tpu.memory_space<vmem>>, vector<8x128xf32>
    tpu.vector_store %arg2[%c0_0, %c0_1], %1 {strides = array<i32>} : memref<8x128xf32, #tpu.memory_space<vmem>>, vector<8x128xf32>,
    %c1 = arith.constant 1 : index
    %3 = memref.load %arg1[%c1] : memref<2xf32, #tpu.memory_space<smem>>
    %4 = vector.broadcast %3 : f32 to vector<8x128xf32>
    %c0_2 = arith.constant 0 : index
    %c0_3 = arith.constant 0 : index
    %5 = vector.load %arg3[%c0_2, %c0_3] : memref<8x128xf32, #tpu.memory_space<vmem>>, vector<8x128xf32>
    tpu.vector_store %arg3[%c0_2, %c0_3], %4 {strides = array<i32>} : memref<8x128xf32, #tpu.memory_space<vmem>>, vector<8x128xf32>,
    return
  }
  func.func @transform_0(%arg0: i32) -> i32 {
    %c0_i32 = arith.constant 0 : i32
    %c0_i32_0 = arith.constant 0 : i32
    return %c0_i32 : i32
  }
  func.func @transform_1(%arg0: i32) -> (i32, i32) {
    %c0_i32 = arith.constant 0 : i32
    %c0_i32_0 = arith.constant 0 : i32
    return %arg0, %c0_i32 : i32, i32
  }
  func.func @transform_2(%arg0: i32) -> (i32, i32) {
    %c0_i32 = arith.constant 0 : i32
    %c0_i32_0 = arith.constant 0 : i32
    return %arg0, %c0_i32 : i32, i32
  }
}

</mosaic_0001>

<bundles_post_ra>
// kernel: tpu_custom_call.1
= control target key start
LH: loop header
LB: loop body
LE: loop exit
PB: predicated region body
PF: predicated region fallthrough
CT: control target
= control target key end

     0   :  { %8 = vsyncpa [#allocation4], 0  ;;  %s176_s0 = inlined_call_operand.hbm [shape: f32[2], index: 0, kind: input, shape index: {}]   ;;  %s177_s1 = inlined_call_operand.hbm [shape: f32[8,128], index: 1, kind: output, shape index: {0}]   ;;  %s178_s2 = inlined_call_operand.hbm [shape: f32[8,128], index: 2, kind: output, shape index: {1}]  }
   0x1   :  { %9 = vsyncpa [#allocation3], 0 }
   0x2   :  { %10 = vsyncpa [#allocation7], 0  ;;  %s62_s11 = scalar_lea.hbm %s176_s0, 16 }
   0x3   :  { %p63_p0 = scmp.ne.s32.totalorder %s176_s0, %s62_s11  ;;  %p66_p1 = scmp.lt.u32.totalorder %s62_s11, %s176_s0 }
   0x5   :  { %p68_p2 = pnand %p66_p1, %p63_p0 }
   0x7   :  { %71 = shalt.err (!%p68_p2)
}
   0x8   :  { %s122_s16 = smov [#allocation2]  }
   0x9   :  { %18 = dma.hbm_to_smem %s176_s0, 16, %s122_s16, [#allocation4]  }
   0xa   :  { %116 = dma.done.wait [#allocation4], 16  }
   0xb   :  { %117 = vsyncadd [#allocation4], 4294967280 }
   0xc   :  { %22 = sfence }
   0xd   :  { %s23_s19 = sld [smem:[#allocation2]]  ;;  %s58_s20 = sld [smem:[#allocation2 + $0x1]] }
   0xe   :  { %s123_s21 = smov [#allocation5]   ;;  %s124_s23 = smov [#allocation6]  }
   0xf   :  { %s35_s22 = sshll.u32 %s123_s21, 4  ;;  %s45_s24 = sshll.u32 %s124_s23, 4  ;;  %s36_s22 = int_to_ptr.vmem [resolvable:$true] %s35_s22  ;;  %s46_s24 = int_to_ptr.vmem [resolvable:$true] %s45_s24 }
  0x10   :  { %s72_s25 = scalar_lea.vmem %s36_s22, 128  ;;  %p77_p4 = scmp.lt.s32.totalorder %s36_s22, %s36_s22 }
  0x11   :  { %p73_p3 = scmp.ne.s32.totalorder %s36_s22, %s72_s25  ;;  %p78_p5 = scmp.lt.s32.totalorder %s72_s25, %s72_s25 }
  0x13   :  { %v24_v0 = vstv %s23_s19  ;;  %v27_v1 = vstv %s58_s20  ;;  %p79_p6 = por %p78_p5, %p77_p4 }
  0x14   :  { %25 = vst [vmem:[#allocation5] sm:$0xff] %v24_v0  ;;  %28 = vst [vmem:[#allocation6] sm:$0xff] %v27_v1 }
  0x15   :  { %p80_p7 = pnand %p79_p6, %p73_p3 }
  0x17   :  { %83 = shalt.err (!%p80_p7)
}
  0x18   :  { %s84_s27 = scalar_lea.hbm %s177_s1, 128 }
  0x19   :  { %p85_p8 = scmp.ne.s32.totalorder %s177_s1, %s84_s27  ;;  %p88_p9 = scmp.lt.u32.totalorder %s84_s27, %s177_s1 }
  0x1b   :  { %p90_p10 = pnand %p88_p9, %p85_p8 }
  0x1d   :  { %93 = shalt.err (!%p90_p10)
}
  0x1e   :  { %38 = dma.vmem_to_hbm [thread:$0]  %s36_s22, 128, %s177_s1, [#allocation3]  }
  0x1f   :  { %s94_s6 = scalar_lea.vmem %s46_s24, 128  ;;  %p99_p12 = scmp.lt.s32.totalorder %s46_s24, %s46_s24 }
  0x20   :  { %p95_p11 = scmp.ne.s32.totalorder %s46_s24, %s94_s6  ;;  %p100_p13 = scmp.lt.s32.totalorder %s94_s6, %s94_s6 }
  0x22   :  { %p101_p0 = por %p100_p13, %p99_p12 }
  0x24   :  { %p102_p1 = pnand %p101_p0, %p95_p11 }
  0x26   :  { %105 = shalt.err (!%p102_p1)
}
  0x27   :  { %s106_s9 = scalar_lea.hbm %s178_s2, 128 }
  0x28   :  { %p107_p2 = scmp.ne.s32.totalorder %s178_s2, %s106_s9  ;;  %p110_p3 = scmp.lt.u32.totalorder %s106_s9, %s178_s2 }
  0x2a   :  { %p112_p4 = pnand %p110_p3, %p107_p2 }
  0x2c   :  { %115 = shalt.err (!%p112_p4)
}
  0x2d   :  { %48 = dma.vmem_to_hbm [thread:$0]  %s46_s24, 128, %s178_s2, [#allocation7]  }
  0x2e   :  { %118 = dma.done.wait [#allocation3], 128  }
  0x2f   :  { %119 = vsyncadd [#allocation3], 4294967168 }
  0x30   :  { %120 = dma.done.wait [#allocation7], 128  }
  0x31   :  { %121 = vsyncadd [#allocation7], 4294967168 }
  0x32   :  { %55 = vsyncpa [#allocation3], 1 }
  0x33   :  { %56 = vsyncpa [#allocation7], 1 }
  0x34   :  { %57 = vsyncpa [#allocation4], 1 }

</bundles_post_ra>
